<compile_context>
chip_gen: v6e
topology: v6e:2x2x1
jax: 0.10.0
libtpu: 0.0.40
codegen_flags: <defaults>
</compile_context>

<pallas_src>
import functools

import jax
import jax.numpy as jnp
from jax.experimental import pallas as pl
from jax.experimental.pallas import tpu as pltpu


# --------------------------------- kernel ---------------------------------

def _se_kernel(x_ref, w1t_ref, w2t_ref, o_ref, *, inv_hw):
    # x_ref:   (Bt, C, HW)  batch tile; channels on sublanes, pixels on lanes
    # w1t_ref: (C, Cr)      fc1 weight, transposed to (in=C, out=Cr)
    # w2t_ref: (Cr, C)      fc2 weight, transposed to (in=Cr, out=C) -> C lane-dense
    # o_ref:   (Bt, C, HW)  gated output (same dtype as input)
    x = x_ref[...]                                               # native dtype, no full-tile upcast

    # --- global average pool over the spatial (lane) axis, f32 accumulation ---
    pooled = jnp.sum(x, axis=-1, dtype=jnp.float32) * inv_hw     # (Bt, C) f32

    # --- fc1 -> GELU -> fc2 -> sigmoid (tiny matmuls, all in f32) ---
    h = jnp.dot(pooled, w1t_ref[...].astype(jnp.float32),
                preferred_element_type=jnp.float32)              # (Bt, Cr)
    # TODO(synk): torch nn.GELU() is exact-erf; tanh-approx GELU used here (EUP-friendly).
    h = jax.nn.gelu(h)
    gate = jnp.dot(h, w2t_ref[...].astype(jnp.float32),
                   preferred_element_type=jnp.float32)           # (Bt, C)
    gate = jax.nn.sigmoid(gate)

    # --- channel gating in the I/O dtype, broadcast over the spatial lanes ---
    o_ref[...] = x * gate[:, :, None].astype(o_ref.dtype)


# --------------------------------- wrapper ---------------------------------

def _pick_block_batch(B, per_elem_bytes, target_bytes=2 * 1024 * 1024):
    """Batch-tile size: ~2 MiB per x tile, but keep >= 2 grid steps (v7x megacore)."""
    bt = max(1, target_bytes // max(1, per_elem_bytes))
    bt = min(bt, B)
    if B >= 2:
        bt = min(bt, pl.cdiv(B, 2))
    return int(bt)


def se_forward(x_nchw, w_fc1, w_fc2, *, block_batch=None):
    """SE forward.

    x_nchw: (B, C, H, W)  NCHW input (matches the PyTorch module); f32 or bf16
    w_fc1:  (Cr, C)       torch nn.Linear(C, Cr, bias=False).weight
    w_fc2:  (C, Cr)       torch nn.Linear(Cr, C, bias=False).weight
    """
    B, C, H, W = x_nchw.shape
    Cr = w_fc1.shape[0]
    HW = H * W

    # NCHW -> (B, C, H*W): contiguous reshape; spatial dim on the lane axis (keep it
    # as the full, untiled last block dim so stores stay lane-dense/unmasked).
    x3 = x_nchw.reshape(B, C, HW)
    w1t = jnp.transpose(w_fc1)                                   # (C, Cr)
    w2t = jnp.transpose(w_fc2)                                   # (Cr, C) -> C on lanes

    itemsize = jnp.dtype(x_nchw.dtype).itemsize
    bt = block_batch if block_batch is not None else _pick_block_batch(B, C * HW * itemsize)
    grid = (pl.cdiv(B, bt),)

    kernel = functools.partial(_se_kernel, inv_hw=1.0 / HW)

    out = pl.pallas_call(
        kernel,
        out_shape=jax.ShapeDtypeStruct((B, C, HW), x_nchw.dtype),
        grid_spec=pltpu.PrefetchScalarGridSpec(
            num_scalar_prefetch=0,
            grid=grid,
            in_specs=[
                pl.BlockSpec((bt, C, HW), lambda b: (b, 0, 0)),
                pl.BlockSpec((C, Cr), lambda b: (0, 0)),
                pl.BlockSpec((Cr, C), lambda b: (0, 0)),
            ],
            out_specs=pl.BlockSpec((bt, C, HW), lambda b: (b, 0, 0)),
        ),
        # ~2 MiB tiles * (in + out) * double-buffer ~= 8 MiB -> fits the scoped-VMEM
        # default on v5e/v6e/v7x, so no vmem_limit_bytes override is needed.
        compiler_params=pltpu.CompilerParams(dimension_semantics=("parallel",)),
    )(x3, w1t, w2t)

    return out.reshape(B, C, H, W)


# ----------------------------------- main -----------------------------------

if __name__ == "__main__":
    key = jax.random.PRNGKey(0)
    B, C, H, W = 2, 32, 8, 16          # H*W = 128 -> lane-dense blocks
    expansion = 0.25
    Cr = int(C * expansion)            # hidden dim of the SE bottleneck

    kx, k1, k2 = jax.random.split(key, 3)
    x = jax.random.normal(kx, (B, C, H, W), jnp.float32)
    w_fc1 = jax.random.normal(k1, (Cr, C), jnp.float32) * 0.1   # Linear(C -> Cr), no bias
    w_fc2 = jax.random.normal(k2, (C, Cr), jnp.float32) * 0.1   # Linear(Cr -> C), no bias

    # ---- f32 path ----
    out = jax.block_until_ready(se_forward(x, w_fc1, w_fc2))

    # pure-JAX reference (same tanh-GELU approximation)
    pooled = jnp.mean(x, axis=(2, 3))                 # (B, C)
    hid = jax.nn.gelu(pooled @ w_fc1.T)               # (B, Cr)
    gate = jax.nn.sigmoid(hid @ w_fc2.T)              # (B, C)
    ref = x * gate[:, :, None, None]

    assert out.shape == x.shape, (out.shape, x.shape)
    assert bool(jnp.all(jnp.isfinite(out)))
    max_err = float(jnp.max(jnp.abs(out - ref)))
    assert max_err < 1e-5, max_err

    # ---- bf16 I/O path (halves HBM traffic; gate still computed in f32) ----
    xb = x.astype(jnp.bfloat16)
    outb = jax.block_until_ready(se_forward(xb, w_fc1, w_fc2))
    assert outb.dtype == jnp.bfloat16
    pooled_b = jnp.mean(xb.astype(jnp.float32), axis=(2, 3))
    gate_b = jax.nn.sigmoid(jax.nn.gelu(pooled_b @ w_fc1.T) @ w_fc2.T)
    ref_b = xb.astype(jnp.float32) * gate_b[:, :, None, None]
    assert bool(jnp.all(jnp.isfinite(outb)))
    max_err_b = float(jnp.max(jnp.abs(outb.astype(jnp.float32) - ref_b)))
    assert max_err_b < 5e-2, max_err_b

    print("KERNEL_OK")
</pallas_src>

<mosaic_0001>
module attributes {stable_mosaic.version = 11 : i64} {
  func.func @_se_kernel(%arg0: i32, %arg1: memref<1x32x128xf32, #tpu.memory_space<vmem>>, %arg2: memref<32x8xf32, #tpu.memory_space<vmem>>, %arg3: memref<8x32xf32, #tpu.memory_space<vmem>>, %arg4: memref<1x32x128xf32, #tpu.memory_space<vmem>>) attributes {dimension_semantics = [#tpu.dimension_semantics<parallel>], iteration_bounds = array<i64: 2>, scalar_prefetch = 0 : i64, scratch_operands = 0 : i64, tpu.core_type = #tpu.core_type<tc>, window_params = [{transform_indices = @transform_0, window_bounds = array<i64: 1, 32, 128>}, {pipeline_mode = #tpu.pipeline_mode<synchronous>, transform_indices = @transform_1, window_bounds = array<i64: 32, 8>}, {pipeline_mode = #tpu.pipeline_mode<synchronous>, transform_indices = @transform_2, window_bounds = array<i64: 8, 32>}, {transform_indices = @transform_3, window_bounds = array<i64: 1, 32, 128>}]} {
    %c0 = arith.constant 0 : index
    %c0_0 = arith.constant 0 : index
    %c0_1 = arith.constant 0 : index
    %0 = vector.load %arg1[%c0, %c0_0, %c0_1] : memref<1x32x128xf32, #tpu.memory_space<vmem>>, vector<1x32x128xf32>
    %cst = arith.constant dense<0.000000e+00> : vector<1x32xf32>
    %1 = vector.multi_reduction <add>, %0, %cst [2] : vector<1x32x128xf32> to vector<1x32xf32>
    %cst_2 = arith.constant 7.812500e-03 : f32
    %2 = vector.broadcast %cst_2 : f32 to vector<1x32xf32>
    %3 = arith.mulf %1, %2 : vector<1x32xf32>
    %c0_3 = arith.constant 0 : index
    %c0_4 = arith.constant 0 : index
    %4 = vector.load %arg2[%c0_3, %c0_4] : memref<32x8xf32, #tpu.memory_space<vmem>>, vector<32x8xf32>
    %cst_5 = arith.constant dense<0.000000e+00> : vector<1x8xf32>
    %5 = tpu.matmul %3, %4, %cst_5 {dimension_numbers = #tpu.dot_dimension_numbers<[1], [0], [0], [1], [0, 0, 1, 1], [], []>} : vector<1x32xf32>, vector<32x8xf32>, vector<1x8xf32> -> vector<1x8xf32>
    %6 = arith.mulf %5, %5 : vector<1x8xf32>
    %7 = arith.mulf %5, %6 : vector<1x8xf32>
    %cst_6 = arith.constant 4.471500e-02 : f32
    %8 = vector.broadcast %cst_6 : f32 to vector<1x8xf32>
    %9 = arith.mulf %8, %7 : vector<1x8xf32>
    %10 = arith.addf %5, %9 : vector<1x8xf32>
    %cst_7 = arith.constant 0.797884583 : f32
    %11 = vector.broadcast %cst_7 : f32 to vector<1x8xf32>
    %12 = arith.mulf %11, %10 : vector<1x8xf32>
    %13 = math.tanh %12 : vector<1x8xf32>
    %cst_8 = arith.constant 1.000000e+00 : f32
    %14 = vector.broadcast %cst_8 : f32 to vector<1x8xf32>
    %15 = arith.addf %14, %13 : vector<1x8xf32>
    %cst_9 = arith.constant 5.000000e-01 : f32
    %16 = vector.broadcast %cst_9 : f32 to vector<1x8xf32>
    %17 = arith.mulf %16, %15 : vector<1x8xf32>
    %18 = arith.mulf %5, %17 : vector<1x8xf32>
    %c0_10 = arith.constant 0 : index
    %c0_11 = arith.constant 0 : index
    %19 = vector.load %arg3[%c0_10, %c0_11] : memref<8x32xf32, #tpu.memory_space<vmem>>, vector<8x32xf32>
    %cst_12 = arith.constant dense<0.000000e+00> : vector<1x32xf32>
    %20 = tpu.matmul %18, %19, %cst_12 {dimension_numbers = #tpu.dot_dimension_numbers<[1], [0], [0], [1], [0, 0, 1, 1], [], []>} : vector<1x8xf32>, vector<8x32xf32>, vector<1x32xf32> -> vector<1x32xf32>
    %21 = arith.negf %20 : vector<1x32xf32>
    %22 = math.exp %21 : vector<1x32xf32>
    %cst_13 = arith.constant 1.000000e+00 : f32
    %23 = vector.broadcast %cst_13 : f32 to vector<1x32xf32>
    %24 = arith.addf %23, %22 : vector<1x32xf32>
    %25 = arith.divf %23, %24 : vector<1x32xf32>
    %26 = vector.shape_cast %25 : vector<1x32xf32> to vector<1x32x1xf32>
    %27 = vector.broadcast %26 : vector<1x32x1xf32> to vector<1x32x128xf32>
    %28 = arith.mulf %0, %27 : vector<1x32x128xf32>
    %c0_14 = arith.constant 0 : index
    %c0_15 = arith.constant 0 : index
    %c0_16 = arith.constant 0 : index
    %29 = vector.load %arg4[%c0_14, %c0_15, %c0_16] : memref<1x32x128xf32, #tpu.memory_space<vmem>>, vector<1x32x128xf32>
    tpu.vector_store %arg4[%c0_14, %c0_15, %c0_16], %28 {strides = array<i32>} : memref<1x32x128xf32, #tpu.memory_space<vmem>>, vector<1x32x128xf32>,
    return
  }
  func.func @transform_0(%arg0: i32) -> (i32, i32, i32) {
    %c0_i32 = arith.constant 0 : i32
    %c0_i32_0 = arith.constant 0 : i32
    %c0_i32_1 = arith.constant 0 : i32
    return %arg0, %c0_i32, %c0_i32_0 : i32, i32, i32
  }
  func.func @transform_1(%arg0: i32) -> (i32, i32) {
    %c0_i32 = arith.constant 0 : i32
    %c0_i32_0 = arith.constant 0 : i32
    %c0_i32_1 = arith.constant 0 : i32
    return %c0_i32, %c0_i32_0 : i32, i32
  }
  func.func @transform_2(%arg0: i32) -> (i32, i32) {
    %c0_i32 = arith.constant 0 : i32
    %c0_i32_0 = arith.constant 0 : i32
    %c0_i32_1 = arith.constant 0 : i32
    return %c0_i32, %c0_i32_0 : i32, i32
  }
  func.func @transform_3(%arg0: i32) -> (i32, i32, i32) {
    %c0_i32 = arith.constant 0 : i32
    %c0_i32_0 = arith.constant 0 : i32
    %c0_i32_1 = arith.constant 0 : i32
    return %arg0, %c0_i32, %c0_i32_0 : i32, i32, i32
  }
}

</mosaic_0001>

<bundles_post_ra>
// kernel: tpu_custom_call.1
= control target key start
LH: loop header
LB: loop body
LE: loop exit
PB: predicated region body
PF: predicated region fallthrough
CT: control target
= control target key end

     0   :  { %8 = vsyncpa [#allocation3], 0  ;;  %s928_s0 = inlined_call_operand.hbm [shape: f32[2,32,128], index: 0, kind: input, shape index: {}]   ;;  %s929_s1 = inlined_call_operand.vmem [shape: f32[32,8], index: 1, kind: input, shape index: {}]   ;;  %s930_s2 = inlined_call_operand.vmem [shape: f32[8,32], index: 2, kind: input, shape index: {}]   ;;  %s931_s3 = inlined_call_operand.hbm [shape: f32[2,32,128], index: 3, kind: output, shape index: {}]  }
   0x1   :  { %10 = vsyncpa [#allocation3 + $0x1], 0 }
   0x2   :  { %11 = vsyncpa [#allocation4], 0 }
   0x3   :  { %13 = vsyncpa [#allocation4 + $0x1], 0  ;;  %s739_s12 = smov 0   ;;  %s741_s13 = smov 0  }
   0x4   :  { %s743_s14 = smov 0   ;;  %s745_s15 = smov 0  }
   0x5 LB: > { %s760_s16 = sadd.s32 4294967295, %s709_s15   ;;  %s517_s17 = sadd.s32 4294967294, %s709_s15   ;;  %s709_s15 = sphi %s745_s15, %s946_s15   ;;  %s705_s14 = sphi %s743_s14, %s945_s14   ;;  %s701_s13 = sphi %s741_s13, %s944_s13   ;;  %s697_s12 = sphi %s739_s12, %s943_s12  }
   0x6   : > { %s764_s18 = sadd.s32 1, %s709_s15   ;;  %s26_s19 = sadd.s32 1, %s705_s14 }
   0x7   : > { %s23_s20 = ssub.s32 %s709_s15, %s764_s18  ;;  %p33_p0 = scmp.ne.s32.totalorder %s705_s14, %s701_s13 }
   0x8   : > { %p24_p1 = scmp.eq.s32.totalorder %s23_s20, 0  ;;  %p34_p2 = scmp.eq.s32.totalorder %s709_s15, 0 }
   0x9   : > { %p39_p3 = scmp.ne.s32.totalorder %s701_s13, %s697_s12  ;;  %p40_p4 = scmp.eq.s32.totalorder %s760_s16, 0 }
   0xa   : > { %s776_s21 = scalar_select %p24_p1, %s705_s14, %s26_s19  }
   0xb   : > { %p778_p5 = por %p34_p2, %p33_p0  ;;  %p782_p6 = por %p40_p4, %p39_p3 }
   0xc   : > { %p105_p7 = scmp.eq.s32.totalorder %s760_s16, 1  ;;  %p111_p8 = scmp.eq.s32.totalorder %s517_s17, 1 }
   0xd   : > { %s935_s23 = scalar_select %p782_p6, 1, 0 }
   0xe   : > { %p571_p10 = scmp.lt.s32.totalorder %s709_s15, 2  ;;  %p789_p11 = por %p105_p7, %p33_p0 }
   0xf   : > { %p793_p12 = por %p111_p8, %p39_p3  ;;  %s137_s26 = sand.u32 1, %s705_s14  }
  0x10   : > { %s936_s24 = scalar_select %p789_p11, 1, 0 }
  0x11   : > { %s937_s25 = scalar_select %p793_p12, 1, 0 }
  0x12   : > { %s534_s27 = sshll.u32 %s709_s15, 9  ;;  %s520_s28 = sshll.u32 %s137_s26, 5 }
  0x13   : > { %s802_s4 = scalar_lea.hbm %s928_s0, %s534_s27  ;;  %s141_s5 = scalar_lea.vmem [#allocation2], %s520_s28 }
  0x14   : > { %s148_s6 = sshll.u32 %s141_s5, 4  ;;  %p806_p13 = pnand %p571_p10, %p778_p5  ;;  %s810_s6 = int_to_ptr.vmem [resolvable:$true] %s148_s6 }
  0x15   : > { %s812_s8 = scalar_lea.sflag [#allocation3], %s137_s26  ;;  %s617_s9 = scalar_lea.hbm %s802_s4, 512 }
  0x16   : > { %p618_p0 = scmp.ne.s32.totalorder %s802_s4, %s617_s9  ;;  %p619_p1 = pneg %p806_p13 }
  0x17   : > { %s622_s17 = scalar_lea.hbm %s928_s0, 1024  ;;  %p623_p4 = scmp.lt.s32.totalorder %s802_s4, %s928_s0 }
  0x18   : > { %p620_p2 = pnand %p619_p1, %p618_p0  ;;  %p624_p5 = scmp.lt.s32.totalorder %s622_s17, %s617_s9 }
  0x1a   : > { %p621_p3 = pneg %p620_p2  ;;  %p625_p7 = por %p624_p5, %p623_p4 }
  0x1c   : > { %p626_p8 = pnand %p625_p7, %p621_p3 }
  0x1e   : > { %629 = shalt.err (!%p626_p8)
}
  0x1f   : > { %s630_s22 = scalar_lea.vmem %s810_s6, 512  ;;  %s711_s26 = smov [#allocation2]  }
  0x20   : > { %p631_p10 = scmp.ne.s32.totalorder %s810_s6, %s630_s22  ;;  %s635_s27 = sshll.u32 %s711_s26, 4  ;;  %s636_s27 = int_to_ptr.vmem [resolvable:$false] %s635_s27 }
  0x21   : > { %s637_s28 = scalar_lea.vmem %s636_s27, 1024  ;;  %p638_p2 = scmp.lt.s32.totalorder %s810_s6, %s636_s27 }
  0x22   : > { %p633_p9 = pnand %p631_p10, %p619_p1  ;;  %p639_p12 = scmp.lt.s32.totalorder %s637_s28, %s630_s22 }
  0x24   : > { %p634_p0 = pneg %p633_p9  ;;  %p640_p11 = por %p639_p12, %p638_p2 }
  0x26   : > { %p641_p6 = pnand %p640_p11, %p634_p0 }
  0x28   : > { %644 = shalt.err (!%p641_p6)
}
  0x29   : > { %s712_s29 = smov 128   ;;  %s713_s30 = smov 8  }
  0x2a   : > { %566 = dma.hbm_to_vmem [thread:$0]  (!%p806_p13), %s802_s4, 512, %s810_s6, %s812_s8, %s712_s29, %s712_s29, %s713_s30  }
  0x2b   : > { %p523_p9 = scmp.ge.s32.totalorder %s709_s15, 1  ;;  %p156_p1 = scmp.lt.s32.totalorder %s709_s15, 3 }
  0x2d   : > { %p157_p3 = pnand %p523_p9, %p156_p1 }
  0x2e   : > { %s836_s5 = sand.u32 (!%p157_p3), 1, %s701_s13   ;;  %p939_p6 = scmp.ne.s32.totalorder (!%p157_p3), %s935_s23, 0 }
  0x2f   : > { %160 = sbr.rel (%p157_p3) target bundleno = 792 (0x318), region = 32  ;;  %s524_s9 = sshll.u32 (!%p157_p3), %s836_s5, 5 }
  0x30   : > { %s163_s10 = scalar_lea.sflag (!%p157_p3), [#allocation3], %s836_s5  ;;  %s166_s11 = scalar_lea.vmem (!%p157_p3), [#allocation2], %s524_s9 }
  0x34   : > { %688 = dma.done.wait (%p939_p6), %s163_s10, 512  }
  0x35   : > { %690 = vsyncadd (%p939_p6), %s163_s10, 4294966784  ;;  %v846_v0 = vld [vmem:[%s166_s11] sm:$0xff]  ;;  %v848_v1 = vld [vmem:[%s166_s11 + $0x10] sm:$0xff]  ;;  %v714_v4 = vmov 0.0   ;;  %vm715_vm0 = vmmov 0   ;;  %v213_v9 = vlaneseq  ;;  %vm224_vm1 = vcmask 130112  }
  0x36   : > { %193 = vadd.xlane.f32.xlu0 %v846_v0  ;;  %197 = vadd.xlane.f32.xlu1 %v848_v1  ;;  %v852_v2 = vld [vmem:[%s166_s11 + $0x8] sm:$0xff]  ;;  %v854_v3 = vld [vmem:[%s166_s11 + $0x18] sm:$0xff]  ;;  %v207_v6 = vld [vmem:[%s929_s1 + $0x10] sm:$0xff]  ;;  %vm231_vm2 = vcmask 195712   ;;  %vm238_vm3 = vcmask 261312   ;;  %vm240_vm4 = vcmask 261120  }
  0x37   : > { %543 = vmatprep.subr.mxu0 %v714_v4  ;;  %v208_v5 = vld [vmem:[%s929_s1 + $0x18] sm:$0xff]  ;;  %554 = vmatprep.subr.mxu1 %v714_v4  ;;  %v206_v7 = vld [vmem:[%s929_s1 + $0x8] sm:$0xff]  ;;  %v205_v8 = vld [vmem:[%s929_s1] sm:$0xff]  ;;  %v214_v10 = vand.u32 127, %v213_v9  ;;  %v216_v11 = vshrl.u32 %v213_v9, 7  ;;  %vm323_vm5 = vcmask 64512  }
  0x38   : > { %544 = vmatpush3.msra.mxu0 %v208_v5  ;;  %551 = vmatprep.mubr.msk.f32.mxu0 %vm715_vm0, %v714_v4  ;;  %v322_v34 = vld [vmem:[%s930_s2] sm:$0xff]  ;;  %s188_s27 = scalar_lea.vmem [#allocation5], %s524_s9  ;;  %s535_s29 = sshll.u32 %s760_s16, 9 }
  0x39   : > { %545 = vmatprep.subr.mxu0 %v714_v4  ;;  %556 = vmatprep.mubr.msk.f32.mxu1 %vm715_vm0, %v714_v4  ;;  %v219_v12 = vadd.s32 4294967288, %v214_v10  ;;  %v233_v13 = vadd.s32 4294967272, %v214_v10  ;;  %v226_v15 = vadd.s32 4294967280, %v214_v10  ;;  %v217_v17 = vsub.s32 %v214_v10, %v216_v11  ;;  %s444_s28 = sshll.u32 %s188_s27, 4  ;;  %s884_s11 = scalar_lea.hbm %s931_s3, %s535_s29  ;;  %s879_s28 = int_to_ptr.vmem [resolvable:$true] %s444_s28 }
  0x3a   : > { %195 = vadd.xlane.f32.xlu0 %v852_v2  ;;  %199 = vadd.xlane.f32.xlu1 %v854_v3  ;;  %v405_v51 = vsub.s32 0, %v216_v11  ;;  %s431_s9 = scalar_lea.sflag [#allocation4], %s836_s5  ;;  %s645_s23 = scalar_lea.vmem %s879_s28, 512 }
  0x3b   : > { %546 = vmatpush3.msra.mxu0 %v207_v6  ;;  %v222_v19 = vsub.s32 %v219_v12, %v216_v11  ;;  %v236_v20 = vsub.s32 %v233_v13, %v216_v11  ;;  %v229_v21 = vsub.s32 %v226_v15, %v216_v11  ;;  %555 = vmatpush3.msra.mxu1 %v322_v34  ;;  %p646_p11 = scmp.ne.s32.totalorder %s879_s28, %s645_s23  ;;  %p940_p12 = scmp.ne.s32.totalorder %s936_s24, 0 }
  0x3c   : > { %547 = vmatprep.subr.mxu0 %v714_v4  ;;  %s716_s16 = smov [#allocation5]  }
  0x3d   : > { %548 = vmatpush3.msra.mxu0 %v206_v7  ;;  %p647_p13 = pnand %p646_p11, %p940_p12  ;;  %s649_s4 = sshll.u32 %s716_s16, 4  ;;  %s650_s4 = int_to_ptr.vmem [resolvable:$false] %s649_s4 }
  0x3e   : > { %549 = vmatprep.subr.mxu0 %v714_v4  ;;  %s651_s6 = scalar_lea.vmem %s650_s4, 1024  ;;  %p652_p5 = scmp.lt.s32.totalorder %s879_s28, %s650_s4 }
  0x3f   : > { %550 = vmatpush3.msra.mxu0 %v205_v8  ;;  %p648_p4 = pneg %p647_p13  ;;  %p653_p7 = scmp.lt.s32.totalorder %s651_s6, %s645_s23 }
  0x41   : > { %p654_p8 = por %p653_p7, %p652_p5 }
  0x43   : > { %p655_p10 = pnand %p654_p8, %p648_p4 }
  0xbf   : > { %v194_v14 = vpop.xlane.xlu0 %193  ;;  %v198_v16 = vpop.xlane.xlu1 %197 }
  0xc0   : > { %v201_v18 = vmul.f32 0.0078125, %v194_v14  ;;  %v203_v22 = vmul.f32 0.0078125, %v198_v16 }
  0xc2   : > { %v218_v27 = vrot.slane %v201_v18, %v217_v17  ;;  %v230_v30 = vrot.slane %v203_v22, %v229_v21 }
  0xc3   : > { %v196_v23 = vpop.xlane.xlu0 %195  ;;  %v200_v24 = vpop.xlane.xlu1 %199 }
  0xc4   : > { %v202_v25 = vmul.f32 0.0078125, %v196_v23  ;;  %v204_v26 = vmul.f32 0.0078125, %v200_v24 }
  0xc6   : > { %v223_v28 = vrot.slane %v202_v25, %v222_v19  ;;  %v237_v29 = vrot.slane %v204_v26, %v236_v20 }
  0xc8   : > { %v225_v31 = vsel %vm224_vm1, %v223_v28, %v218_v27 }
  0xc9   : > { %v232_v32 = vsel %vm231_vm2, %v230_v30, %v225_v31 }
  0xca   : > { %v239_v33 = vsel %vm238_vm3, %v237_v29, %v232_v32 }
  0xcb   : > { %552 = vmatmul.mubr.msk.f32.vlgmr.msra.gmra.mxu0 %vm240_vm4, %v239_v33 }
 0x18b   : > { %v309_v35 = vpop.f32.mrf.mxu0 }
 0x18c   : > { %v313_v36 = vmul.f32 %v309_v35, %v309_v35 }
 0x18d   : > { %v553_v37 = vpop.f32.mrf.mxu0 }
 0x18e   : > { %v314_v38 = vmul.f32 %v313_v36, %v309_v35 }
 0x190   : > { %v315_v39 = vmul.f32 0.044715, %v314_v38 }
 0x192   : > { %v316_v40 = vadd.f32 %v315_v39, %v309_v35 }
 0x194   : > { %v317_v41 = vmul.f32 0.7978846, %v316_v40 }
 0x196   : > { %611 = vtanh.f32 %v317_v41 }
 0x1a3   : > { %v612_v42 = vpop.eup %611 }
 0x1a4   : > { %v319_v43 = vadd.f32 1.0, %v612_v42 }
 0x1a6   : > { %v320_v44 = vmul.f32 0.5, %v319_v43 }
 0x1a8   : > { %v321_v45 = vmul.f32 %v320_v44, %v309_v35 }
 0x1aa   : > { %557 = vmatmul.mubr.msk.f32.vlgmr.msra.gmra.mxu1 %vm323_vm5, %v321_v45 }
 0x26a   : > { %v393_v46 = vpop.f32.mrf.mxu1 }
 0x26b   : > { %v528_v47 = vmul.f32 -1.442695, %v393_v46 }
 0x26c   : > { %v558_v48 = vpop.f32.mrf.mxu1 }
 0x26d   : > { %613 = vpow2.f32 %v528_v47 }
 0x27a   : > { %v614_v49 = vpop.eup %613 }
 0x27b   : > { %v400_v50 = vadd.f32 1.0, %v614_v49 }
 0x27d   : > { %615 = vrcp.f32 %v400_v50 }
 0x28a   : > { %v616_v52 = vpop.eup %615 }
 0x28b   : > { %v406_v53 = vrot.slane %v616_v52, %v405_v51 }
 0x28d   : > { %412 = vbcast.lane.b32.xlu1 %v406_v53, 264  ;;  %408 = vbcast.lane.b32.xlu0 %v406_v53, 256 }
 0x291   : > { %416 = vbcast.lane.b32.xlu1 %v406_v53, 272 }
 0x295   : > { %420 = vbcast.lane.b32.xlu1 %v406_v53, 280 }
 0x2ff   : > { %v413_v54 = vpop.permute.xlu1 %412  ;;  %v409_v55 = vpop.permute.xlu0 %408 }
 0x300   : > { %v423_v56 = vmul.f32 %v413_v54, %v852_v2  ;;  %v422_v57 = vmul.f32 %v409_v55, %v846_v0 }
 0x302   : > { %427 = vst [vmem:[%s188_s27 + $0x8] sm:$0xff] %v423_v56  ;;  %426 = vst [vmem:[%s188_s27] sm:$0xff] %v422_v57 }
 0x303   : > { %v417_v58 = vpop.permute.xlu1 %416 }
 0x304   : > { %v424_v59 = vmul.f32 %v417_v58, %v848_v1 }
 0x306   : > { %428 = vst [vmem:[%s188_s27 + $0x10] sm:$0xff] %v424_v59 }
 0x307   : > { %v421_v60 = vpop.permute.xlu1 %420 }
 0x308   : > { %v425_v61 = vmul.f32 %v421_v60, %v854_v3 }
 0x30a   : > { %429 = vst [vmem:[%s188_s27 + $0x18] sm:$0xff] %v425_v61 }
 0x30b   : > { %658 = shalt.err (!%p655_p10)
}
 0x30c   : > { %s659_s7 = scalar_lea.hbm %s884_s11, 512  ;;  %s663_s19 = scalar_lea.hbm %s931_s3, 1024 }
 0x30d   : > { %p660_p0 = scmp.ne.s32.totalorder %s884_s11, %s659_s7  ;;  %p664_p1 = scmp.lt.s32.totalorder %s884_s11, %s931_s3 }
 0x30e   : > { %p665_p3 = scmp.lt.s32.totalorder %s663_s19, %s659_s7 }
 0x30f   : > { %p661_p2 = pnand %p660_p0, %p940_p12 }
 0x310   : > { %p666_p6 = por %p665_p3, %p664_p1 }
 0x311   : > { %p662_p9 = pneg %p661_p2 }
 0x313   : > { %p667_p11 = pnand %p666_p6, %p662_p9 }
 0x315   : > { %670 = shalt.err (!%p667_p11)
}
 0x316   : > { %s717_s26 = smov 128   ;;  %s718_s27 = smov 8  }
 0x317   : > { %561 = dma.vmem_to_hbm [thread:$0]  (%p940_p12), %s879_s28, 512, %s884_s11, %s431_s9, %s717_s26, %s717_s26, %s718_s27  }
 0x318 PF: > { %s459_s29 = sand.u32 1, %s697_s12   ;;  %p941_p13 = scmp.ne.s32.totalorder %s937_s25, 0 }
 0x319   : > { %p942_p4 = scmp.ge.s32.totalorder %s709_s15, 2  ;;  %s460_s30 = scalar_lea.sflag [#allocation4], %s459_s29 }
 0x31b   : > { %p568_p5 = pnand %p942_p4, %p941_p13 }
 0x31d   : > { %p569_p7 = pneg %p568_p5 }
 0x31f   : > { %692 = dma.done.wait (%p569_p7), %s460_s30, 512  }
 0x320   : > { %694 = vsyncadd (%p569_p7), %s460_s30, 4294966784  ;;  %p16_p8 = scmp.ge.s32.totalorder %s764_s18, 4   ;;  %s943_s12 = smov %s701_s13 }
 0x321   : > { %s944_s13 = smov %s705_s14  ;;  %s945_s14 = smov %s776_s21 }
 0x322   : > { %s946_s15 = smov %s764_s18  ;;  %18 = sbr.rel (!%p16_p8) target bundleno = 5 (0x5), region = 77 }
 0x327   :  { %465 = vsyncpa [#allocation3], 1 }
 0x328   :  { %467 = vsyncpa [#allocation3 + $0x1], 1 }
 0x329   :  { %468 = vsyncpa [#allocation4], 1 }
 0x32a   :  { %470 = vsyncpa [#allocation4 + $0x1], 1 }

</bundles_post_ra>
